<compile_context>
chip_gen: v7x
topology: tpu7x:2x2x1
jax: 0.10.0
libtpu: 0.0.40
codegen_flags: <defaults>
</compile_context>

<pallas_src>
from functools import partial

import jax
import jax.numpy as jnp
from jax.experimental import pallas as pl
from jax.experimental.pallas import tpu as pltpu

BN_EPS = 1e-5


# --------------------------------------------------------------------------- #
# Kernel
# --------------------------------------------------------------------------- #
def _coord_att_kernel(x_ref, w1_ref, b1_ref, wh_ref, bh_ref, ww_ref, bw_ref,
                      eh_ref, ew_ref, o_ref, *, nb, C, H, W, lane_chunk):
    """One grid step = nb batches merged into a (nb*C, HW_pad) lane-dense slab.

    x_ref / o_ref : (1, nb*C, HW_pad)
    w1_ref (mip,C), b1_ref (mip,1)       conv1 with eval-BN folded in
    wh_ref/ww_ref (oup,mip), bh/bw (oup,1)
    eh_ref (H, HW_pad), ew_ref (W, HW_pad)  one-hot spatial index matrices
    """
    f32 = jnp.float32
    BC = x_ref.shape[1]                       # nb * C
    HW_pad = x_ref.shape[2]
    mip = w1_ref.shape[0]
    oup = wh_ref.shape[0]
    n_chunks = HW_pad // lane_chunk
    dn_t = (((1,), (1,)), ((), ()))           # contract lhs last dim with rhs last dim

    # ---- pass 1: pooled means, chunked over the lane axis (MXU) --------------
    # x_h[(b,c), h] = sum_w x[b,c,h,w] ;  x_w[(b,c), w] = sum_h x[b,c,h,w]
    x_h = jnp.zeros((BC, H), f32)
    x_w = jnp.zeros((BC, W), f32)
    for ci in range(n_chunks):
        s0 = ci * lane_chunk
        xc = x_ref[0, :, s0:s0 + lane_chunk]                       # (BC, L)
        ehc = eh_ref[:, s0:s0 + lane_chunk]                        # (H, L)
        ewc = ew_ref[:, s0:s0 + lane_chunk]                        # (W, L)
        x_h = x_h + jax.lax.dot_general(xc, ehc, dn_t, preferred_element_type=f32)
        x_w = x_w + jax.lax.dot_general(xc, ewc, dn_t, preferred_element_type=f32)
    x_h = x_h * (1.0 / W)                                          # mean over W
    x_w = x_w * (1.0 / H)                                          # mean over H

    # ---- tiny gate path: conv1(+folded BN) -> h_swish -> conv_h/conv_w -> sigmoid
    w1 = w1_ref[...]
    wh = wh_ref[...]
    ww = ww_ref[...]
    # Hoist bias broadcasts out of the per-batch loop (no CSE in-kernel).
    b1h = jnp.broadcast_to(b1_ref[...], (mip, H))
    b1w = jnp.broadcast_to(b1_ref[...], (mip, W))
    bhh = jnp.broadcast_to(bh_ref[...], (oup, H))
    bww = jnp.broadcast_to(bw_ref[...], (oup, W))

    a_h_parts = []
    a_w_parts = []
    for b in range(nb):                       # tiny per-batch matmuls only
        r0 = b * C
        xh_b = x_h[r0:r0 + C, :]              # (C, H)
        xw_b = x_w[r0:r0 + C, :]              # (C, W)
        t_h = jnp.dot(w1, xh_b, preferred_element_type=f32) + b1h   # (mip, H)
        t_w = jnp.dot(w1, xw_b, preferred_element_type=f32) + b1w   # (mip, W)
        t_h = t_h * jnp.clip(t_h + 3.0, 0.0, 6.0) * (1.0 / 6.0)     # h_swish
        t_w = t_w * jnp.clip(t_w + 3.0, 0.0, 6.0) * (1.0 / 6.0)
        a_h_parts.append(jax.nn.sigmoid(
            jnp.dot(wh, t_h, preferred_element_type=f32) + bhh))    # (oup, H)
        a_w_parts.append(jax.nn.sigmoid(
            jnp.dot(ww, t_w, preferred_element_type=f32) + bww))    # (oup, W)
    a_h = a_h_parts[0] if nb == 1 else jnp.concatenate(a_h_parts, axis=0)  # (BC, H)
    a_w = a_w_parts[0] if nb == 1 else jnp.concatenate(a_w_parts, axis=0)  # (BC, W)

    # ---- pass 2: expand gates over lanes in chunks, multiply, store ----------
    # g_h[(b,c), s] = a_h[(b,c), h(s)],  g_w[(b,c), s] = a_w[(b,c), w(s)]
    for ci in range(n_chunks):
        s0 = ci * lane_chunk
        ehc = eh_ref[:, s0:s0 + lane_chunk]                        # (H, L)
        ewc = ew_ref[:, s0:s0 + lane_chunk]                        # (W, L)
        g_h = jnp.dot(a_h, ehc, preferred_element_type=f32)        # (BC, L)
        g_w = jnp.dot(a_w, ewc, preferred_element_type=f32)        # (BC, L)
        # out = identity * a_w * a_h (same order as the PyTorch module)
        o_ref[0, :, s0:s0 + lane_chunk] = x_ref[0, :, s0:s0 + lane_chunk] * g_w * g_h


# --------------------------------------------------------------------------- #
# Host-side sizing helpers
# --------------------------------------------------------------------------- #
def _ceil_to(v, m):
    return -(-v // m) * m


def _tile_bytes(rows, cols, itemsize=4):
    """fp32 VMEM footprint of a (rows, cols) buffer padded to (8, 128) tiles."""
    return _ceil_to(max(rows, 1), 8) * _ceil_to(max(cols, 1), 128) * itemsize


def _device_vmem_bytes():
    try:
        return int(pltpu.get_tpu_info().vmem_capacity_bytes)
    except Exception:
        return 64 * 1024 * 1024  # conservative: v7x per-TensorCore VMEM


def _choose_lane_chunk(hw_pad, max_chunk=2048):
    """Largest multiple of 128 that divides hw_pad and is <= max_chunk."""
    best = 128
    c = 128
    while c <= min(hw_pad, max_chunk):
        if hw_pad % c == 0:
            best = c
        c += 128
    return best


def _choose_block_batches(N, C, hw_pad, slab_budget_bytes, max_nb=8):
    """Pick nb | N so the merged (nb*C, hw_pad) slab fits the budget.

    Megacore-aware: keeps >= 2 grid steps when N allows it, and prefers
    sublane-aligned merged slabs (nb*C % 8 == 0).
    """
    min_steps = 2 if N >= 2 else 1
    feasible = []
    for nb in range(1, min(N, max_nb) + 1):
        if N % nb:
            continue
        if N // nb < min_steps:
            continue
        if _tile_bytes(nb * C, hw_pad) <= slab_budget_bytes:
            feasible.append(nb)
    if not feasible:
        return 1
    return max(feasible, key=lambda nb: ((nb * C) % 8 == 0, nb))


# --------------------------------------------------------------------------- #
# Public wrapper
# --------------------------------------------------------------------------- #
def coord_att(x, params):
    """x: (N, C, H, W) fp32. params: dict of fp32 arrays (see make_params)."""
    N, C, H, W = x.shape
    HW = H * W
    mip = params["w1"].shape[0]
    oup = params["wh"].shape[0]
    assert oup == C, "CoordAtt requires oup == inp for the final elementwise product"

    x = x.astype(jnp.float32)

    # ---- fold eval-mode BatchNorm into conv1 --------------------------------
    # TODO(synk): training-mode BatchNorm (batch statistics) is not implemented;
    # eval-mode running stats are folded into conv1 here.
    scale = params["gamma"][:, 0] * jax.lax.rsqrt(params["var"][:, 0] + BN_EPS)
    w1f = params["w1"] * scale[:, None]                                  # (mip, C)
    b1f = (scale * (params["b1"][:, 0] - params["mean"][:, 0])
           + params["beta"][:, 0])[:, None]                              # (mip, 1)

    # ---- lane-dense, 128-aligned flattened spatial axis ---------------------
    HW_pad = _ceil_to(HW, 128)
    s = jnp.arange(HW_pad, dtype=jnp.int32)
    valid = (s < HW).astype(jnp.float32)
    h_of_s = s // W
    w_of_s = s % W
    eh = ((h_of_s[None, :] == jnp.arange(H, dtype=jnp.int32)[:, None])
          .astype(jnp.float32) * valid[None, :])                         # (H, HW_pad)
    ew = ((w_of_s[None, :] == jnp.arange(W, dtype=jnp.int32)[:, None])
          .astype(jnp.float32) * valid[None, :])                         # (W, HW_pad)

    x_flat = x.reshape(N, C, HW)
    if HW_pad != HW:
        x_flat = jnp.pad(x_flat, ((0, 0), (0, 0), (0, HW_pad - HW)))

    # ---- device-aware VMEM budget, batch blocking, lane chunking ------------
    cap = _device_vmem_bytes()
    usable = int(cap * 0.80)                       # ~51 MiB on v7x, ~102 MiB on v5e/v6e
    param_bytes = (_tile_bytes(mip, C) + _tile_bytes(mip, 1)
                   + 2 * _tile_bytes(oup, mip) + 2 * _tile_bytes(oup, 1)
                   + _tile_bytes(H, HW_pad) + _tile_bytes(W, HW_pad))
    headroom = 4 << 20                             # gate chunks, pooled arrays, compiler scratch
    slab_budget = max((usable - 2 * param_bytes - headroom) // 4, 1 << 20)
    nb = _choose_block_batches(N, C, HW_pad, slab_budget)
    G = N // nb
    BC = nb * C
    lane_chunk = _choose_lane_chunk(HW_pad)

    slab_bytes = _tile_bytes(BC, HW_pad)
    chunk_bytes = 2 * _tile_bytes(BC, lane_chunk)
    est = 4 * slab_bytes + 2 * param_bytes + chunk_bytes + headroom
    vmem_limit = int(min(usable, max(16 << 20, int(est * 1.5))))
    # TODO(synk): if even the nb=1 slab exceeds the per-generation budget
    # (very large C*H*W), a spatially tiled two-pass variant is required.

    # Merge nb batches into one lane-dense slab per grid step (layout-free host reshape).
    xg = x_flat.reshape(G, BC, HW_pad)

    kernel = partial(_coord_att_kernel, nb=nb, C=C, H=H, W=W, lane_chunk=lane_chunk)
    full = lambda shape: pl.BlockSpec(shape, lambda n: (0,) * len(shape))

    out = pl.pallas_call(
        kernel,
        out_shape=jax.ShapeDtypeStruct((G, BC, HW_pad), jnp.float32),
        grid_spec=pltpu.PrefetchScalarGridSpec(
            num_scalar_prefetch=0,
            grid=(G,),
            in_specs=[
                pl.BlockSpec((1, BC, HW_pad), lambda n: (n, 0, 0)),  # x slab
                full((mip, C)),       # folded conv1 weight
                full((mip, 1)),       # folded conv1 bias
                full((oup, mip)),     # conv_h weight
                full((oup, 1)),       # conv_h bias
                full((oup, mip)),     # conv_w weight
                full((oup, 1)),       # conv_w bias
                full((H, HW_pad)),    # one-hot h-index matrix
                full((W, HW_pad)),    # one-hot w-index matrix
            ],
            out_specs=pl.BlockSpec((1, BC, HW_pad), lambda n: (n, 0, 0)),
        ),
        compiler_params=pltpu.CompilerParams(
            dimension_semantics=("parallel",),
            vmem_limit_bytes=vmem_limit,
        ),
    )(xg, w1f, b1f, params["wh"], params["bh"], params["ww"], params["bw"], eh, ew)

    out = out.reshape(N, C, HW_pad)[:, :, :HW].reshape(N, C, H, W)
    return out


# --------------------------------------------------------------------------- #
# Pure-JAX reference (mirrors the PyTorch forward, eval-mode BN)
# --------------------------------------------------------------------------- #
def coord_att_reference(x, params):
    N, C, H, W = x.shape
    x_h = jnp.mean(x, axis=3)                                 # (N, C, H)
    x_w = jnp.mean(x, axis=2)                                 # (N, C, W)
    y = jnp.concatenate([x_h, x_w], axis=2)                   # (N, C, H+W)
    t = jnp.einsum("mc,ncs->nms", params["w1"], y) + params["b1"][None, :, :]
    t = (params["gamma"][None] * (t - params["mean"][None])
         * jax.lax.rsqrt(params["var"][None] + BN_EPS) + params["beta"][None])
    t = t * jnp.clip(t + 3.0, 0.0, 6.0) / 6.0
    t_h, t_w = t[:, :, :H], t[:, :, H:]
    a_h = jax.nn.sigmoid(jnp.einsum("om,nms->nos", params["wh"], t_h)
                         + params["bh"][None, :, :])          # (N, O, H)
    a_w = jax.nn.sigmoid(jnp.einsum("om,nms->nos", params["ww"], t_w)
                         + params["bw"][None, :, :])          # (N, O, W)
    return x * a_w[:, :, None, :] * a_h[:, :, :, None]


def make_params(key, inp, oup, reduction=32):
    mip = max(8, inp // reduction)
    ks = jax.random.split(key, 8)
    return {
        "w1":    jax.random.normal(ks[0], (mip, inp), jnp.float32) * 0.2,
        "b1":    jax.random.normal(ks[1], (mip, 1), jnp.float32) * 0.1,
        "gamma": 1.0 + 0.1 * jax.random.normal(ks[2], (mip, 1), jnp.float32),
        "beta":  0.1 * jax.random.normal(ks[3], (mip, 1), jnp.float32),
        "mean":  0.05 * jax.random.normal(ks[4], (mip, 1), jnp.float32),
        "var":   jnp.abs(1.0 + 0.1 * jax.random.normal(ks[5], (mip, 1),
                                                       jnp.float32)),
        "wh":    jax.random.normal(ks[6], (oup, mip), jnp.float32) * 0.2,
        "bh":    jnp.zeros((oup, 1), jnp.float32),
        "ww":    jax.random.normal(ks[7], (oup, mip), jnp.float32) * 0.2,
        "bw":    jnp.zeros((oup, 1), jnp.float32),
    }


if __name__ == "__main__":
    N, C, H, W = 2, 4, 16, 16            # inp = oup = 4, mip = max(8, 4//32) = 8
    key = jax.random.PRNGKey(0)
    kx, kp = jax.random.split(key)
    x = jax.random.normal(kx, (N, C, H, W), jnp.float32)
    params = make_params(kp, inp=C, oup=C, reduction=32)

    out = jax.block_until_ready(coord_att(x, params))
    ref = coord_att_reference(x, params)

    assert out.shape == (N, C, H, W)
    assert jnp.allclose(out, ref, atol=1e-5, rtol=1e-5), "mismatch vs reference"

    print("KERNEL_OK")
</pallas_src>

<mosaic_0001>
module attributes {stable_mosaic.version = 11 : i64} {
  func.func @_coord_att_kernel(%arg0: i32, %arg1: memref<1x4x256xf32, #tpu.memory_space<vmem>>, %arg2: memref<8x4xf32, #tpu.memory_space<vmem>>, %arg3: memref<8x1xf32, #tpu.memory_space<vmem>>, %arg4: memref<4x8xf32, #tpu.memory_space<vmem>>, %arg5: memref<4x1xf32, #tpu.memory_space<vmem>>, %arg6: memref<4x8xf32, #tpu.memory_space<vmem>>, %arg7: memref<4x1xf32, #tpu.memory_space<vmem>>, %arg8: memref<16x256xf32, #tpu.memory_space<vmem>>, %arg9: memref<16x256xf32, #tpu.memory_space<vmem>>, %arg10: memref<1x4x256xf32, #tpu.memory_space<vmem>>) attributes {dimension_semantics = [#tpu.dimension_semantics<parallel>], iteration_bounds = array<i64: 2>, scalar_prefetch = 0 : i64, scratch_operands = 0 : i64, tpu.core_type = #tpu.core_type<tc>, window_params = [{transform_indices = @transform_0, window_bounds = array<i64: 1, 4, 256>}, {pipeline_mode = #tpu.pipeline_mode<synchronous>, transform_indices = @transform_1, window_bounds = array<i64: 8, 4>}, {pipeline_mode = #tpu.pipeline_mode<synchronous>, transform_indices = @transform_2, window_bounds = array<i64: 8, 1>}, {pipeline_mode = #tpu.pipeline_mode<synchronous>, transform_indices = @transform_3, window_bounds = array<i64: 4, 8>}, {pipeline_mode = #tpu.pipeline_mode<synchronous>, transform_indices = @transform_4, window_bounds = array<i64: 4, 1>}, {pipeline_mode = #tpu.pipeline_mode<synchronous>, transform_indices = @transform_5, window_bounds = array<i64: 4, 8>}, {pipeline_mode = #tpu.pipeline_mode<synchronous>, transform_indices = @transform_6, window_bounds = array<i64: 4, 1>}, {pipeline_mode = #tpu.pipeline_mode<synchronous>, transform_indices = @transform_7, window_bounds = array<i64: 16, 256>}, {pipeline_mode = #tpu.pipeline_mode<synchronous>, transform_indices = @transform_8, window_bounds = array<i64: 16, 256>}, {transform_indices = @transform_9, window_bounds = array<i64: 1, 4, 256>}]} {
    %cst = arith.constant 0.000000e+00 : f32
    %0 = vector.broadcast %cst : f32 to vector<4x16xf32>
    %cst_0 = arith.constant 0.000000e+00 : f32
    %1 = vector.broadcast %cst_0 : f32 to vector<4x16xf32>
    %c0 = arith.constant 0 : index
    %c0_1 = arith.constant 0 : index
    %c0_2 = arith.constant 0 : index
    %2 = vector.load %arg1[%c0, %c0_1, %c0_2] : memref<1x4x256xf32, #tpu.memory_space<vmem>>, vector<1x4x256xf32>
    %3 = vector.shape_cast %2 : vector<1x4x256xf32> to vector<4x256xf32>
    %c0_3 = arith.constant 0 : index
    %c0_4 = arith.constant 0 : index
    %4 = vector.load %arg8[%c0_3, %c0_4] : memref<16x256xf32, #tpu.memory_space<vmem>>, vector<16x256xf32>
    %c0_5 = arith.constant 0 : index
    %c0_6 = arith.constant 0 : index
    %5 = vector.load %arg9[%c0_5, %c0_6] : memref<16x256xf32, #tpu.memory_space<vmem>>, vector<16x256xf32>
    %cst_7 = arith.constant dense<0.000000e+00> : vector<4x16xf32>
    %6 = tpu.matmul %3, %4, %cst_7 {dimension_numbers = #tpu.dot_dimension_numbers<[1], [1], [0], [0], [0, 0, 1, 0], [], []>} : vector<4x256xf32>, vector<16x256xf32>, vector<4x16xf32> -> vector<4x16xf32>
    %7 = arith.addf %0, %6 : vector<4x16xf32>
    %cst_8 = arith.constant dense<0.000000e+00> : vector<4x16xf32>
    %8 = tpu.matmul %3, %5, %cst_8 {dimension_numbers = #tpu.dot_dimension_numbers<[1], [1], [0], [0], [0, 0, 1, 0], [], []>} : vector<4x256xf32>, vector<16x256xf32>, vector<4x16xf32> -> vector<4x16xf32>
    %9 = arith.addf %1, %8 : vector<4x16xf32>
    %cst_9 = arith.constant 6.250000e-02 : f32
    %10 = vector.broadcast %cst_9 : f32 to vector<4x16xf32>
    %11 = arith.mulf %7, %10 : vector<4x16xf32>
    %cst_10 = arith.constant 6.250000e-02 : f32
    %12 = vector.broadcast %cst_10 : f32 to vector<4x16xf32>
    %13 = arith.mulf %9, %12 : vector<4x16xf32>
    %c0_11 = arith.constant 0 : index
    %c0_12 = arith.constant 0 : index
    %14 = vector.load %arg2[%c0_11, %c0_12] : memref<8x4xf32, #tpu.memory_space<vmem>>, vector<8x4xf32>
    %c0_13 = arith.constant 0 : index
    %c0_14 = arith.constant 0 : index
    %15 = vector.load %arg4[%c0_13, %c0_14] : memref<4x8xf32, #tpu.memory_space<vmem>>, vector<4x8xf32>
    %c0_15 = arith.constant 0 : index
    %c0_16 = arith.constant 0 : index
    %16 = vector.load %arg6[%c0_15, %c0_16] : memref<4x8xf32, #tpu.memory_space<vmem>>, vector<4x8xf32>
    %c0_17 = arith.constant 0 : index
    %c0_18 = arith.constant 0 : index
    %17 = vector.load %arg3[%c0_17, %c0_18] : memref<8x1xf32, #tpu.memory_space<vmem>>, vector<8x1xf32>
    %18 = vector.shape_cast %17 : vector<8x1xf32> to vector<8x1xf32>
    %19 = vector.broadcast %18 : vector<8x1xf32> to vector<8x16xf32>
    %c0_19 = arith.constant 0 : index
    %c0_20 = arith.constant 0 : index
    %20 = vector.load %arg3[%c0_19, %c0_20] : memref<8x1xf32, #tpu.memory_space<vmem>>, vector<8x1xf32>
    %21 = vector.shape_cast %20 : vector<8x1xf32> to vector<8x1xf32>
    %22 = vector.broadcast %21 : vector<8x1xf32> to vector<8x16xf32>
    %c0_21 = arith.constant 0 : index
    %c0_22 = arith.constant 0 : index
    %23 = vector.load %arg5[%c0_21, %c0_22] : memref<4x1xf32, #tpu.memory_space<vmem>>, vector<4x1xf32>
    %24 = vector.shape_cast %23 : vector<4x1xf32> to vector<4x1xf32>
    %25 = vector.broadcast %24 : vector<4x1xf32> to vector<4x16xf32>
    %c0_23 = arith.constant 0 : index
    %c0_24 = arith.constant 0 : index
    %26 = vector.load %arg7[%c0_23, %c0_24] : memref<4x1xf32, #tpu.memory_space<vmem>>, vector<4x1xf32>
    %27 = vector.shape_cast %26 : vector<4x1xf32> to vector<4x1xf32>
    %28 = vector.broadcast %27 : vector<4x1xf32> to vector<4x16xf32>
    %cst_25 = arith.constant dense<0.000000e+00> : vector<8x16xf32>
    %29 = tpu.matmul %14, %11, %cst_25 {dimension_numbers = #tpu.dot_dimension_numbers<[1], [0], [0], [1], [0, 0, 1, 1], [], []>} : vector<8x4xf32>, vector<4x16xf32>, vector<8x16xf32> -> vector<8x16xf32>
    %30 = arith.addf %29, %19 : vector<8x16xf32>
    %cst_26 = arith.constant dense<0.000000e+00> : vector<8x16xf32>
    %31 = tpu.matmul %14, %13, %cst_26 {dimension_numbers = #tpu.dot_dimension_numbers<[1], [0], [0], [1], [0, 0, 1, 1], [], []>} : vector<8x4xf32>, vector<4x16xf32>, vector<8x16xf32> -> vector<8x16xf32>
    %32 = arith.addf %31, %22 : vector<8x16xf32>
    %cst_27 = arith.constant 3.000000e+00 : f32
    %33 = vector.broadcast %cst_27 : f32 to vector<8x16xf32>
    %34 = arith.addf %30, %33 : vector<8x16xf32>
    %cst_28 = arith.constant 0.000000e+00 : f32
    %cst_29 = arith.constant 6.000000e+00 : f32
    %35 = vector.broadcast %cst_28 : f32 to vector<8x16xf32>
    %36 = arith.maximumf %35, %34 : vector<8x16xf32>
    %37 = vector.broadcast %cst_29 : f32 to vector<8x16xf32>
    %38 = arith.minimumf %37, %36 : vector<8x16xf32>
    %39 = arith.mulf %30, %38 : vector<8x16xf32>
    %cst_30 = arith.constant 0.166666672 : f32
    %40 = vector.broadcast %cst_30 : f32 to vector<8x16xf32>
    %41 = arith.mulf %39, %40 : vector<8x16xf32>
    %cst_31 = arith.constant 3.000000e+00 : f32
    %42 = vector.broadcast %cst_31 : f32 to vector<8x16xf32>
    %43 = arith.addf %32, %42 : vector<8x16xf32>
    %cst_32 = arith.constant 0.000000e+00 : f32
    %cst_33 = arith.constant 6.000000e+00 : f32
    %44 = vector.broadcast %cst_32 : f32 to vector<8x16xf32>
    %45 = arith.maximumf %44, %43 : vector<8x16xf32>
    %46 = vector.broadcast %cst_33 : f32 to vector<8x16xf32>
    %47 = arith.minimumf %46, %45 : vector<8x16xf32>
    %48 = arith.mulf %32, %47 : vector<8x16xf32>
    %cst_34 = arith.constant 0.166666672 : f32
    %49 = vector.broadcast %cst_34 : f32 to vector<8x16xf32>
    %50 = arith.mulf %48, %49 : vector<8x16xf32>
    %cst_35 = arith.constant dense<0.000000e+00> : vector<4x16xf32>
    %51 = tpu.matmul %15, %41, %cst_35 {dimension_numbers = #tpu.dot_dimension_numbers<[1], [0], [0], [1], [0, 0, 1, 1], [], []>} : vector<4x8xf32>, vector<8x16xf32>, vector<4x16xf32> -> vector<4x16xf32>
    %52 = arith.addf %51, %25 : vector<4x16xf32>
    %53 = arith.negf %52 : vector<4x16xf32>
    %54 = math.exp %53 : vector<4x16xf32>
    %cst_36 = arith.constant 1.000000e+00 : f32
    %55 = vector.broadcast %cst_36 : f32 to vector<4x16xf32>
    %56 = arith.addf %55, %54 : vector<4x16xf32>
    %57 = arith.divf %55, %56 : vector<4x16xf32>
    %cst_37 = arith.constant dense<0.000000e+00> : vector<4x16xf32>
    %58 = tpu.matmul %16, %50, %cst_37 {dimension_numbers = #tpu.dot_dimension_numbers<[1], [0], [0], [1], [0, 0, 1, 1], [], []>} : vector<4x8xf32>, vector<8x16xf32>, vector<4x16xf32> -> vector<4x16xf32>
    %59 = arith.addf %58, %28 : vector<4x16xf32>
    %60 = arith.negf %59 : vector<4x16xf32>
    %61 = math.exp %60 : vector<4x16xf32>
    %cst_38 = arith.constant 1.000000e+00 : f32
    %62 = vector.broadcast %cst_38 : f32 to vector<4x16xf32>
    %63 = arith.addf %62, %61 : vector<4x16xf32>
    %64 = arith.divf %62, %63 : vector<4x16xf32>
    %c0_39 = arith.constant 0 : index
    %c0_40 = arith.constant 0 : index
    %65 = vector.load %arg8[%c0_39, %c0_40] : memref<16x256xf32, #tpu.memory_space<vmem>>, vector<16x256xf32>
    %c0_41 = arith.constant 0 : index
    %c0_42 = arith.constant 0 : index
    %66 = vector.load %arg9[%c0_41, %c0_42] : memref<16x256xf32, #tpu.memory_space<vmem>>, vector<16x256xf32>
    %cst_43 = arith.constant dense<0.000000e+00> : vector<4x256xf32>
    %67 = tpu.matmul %57, %65, %cst_43 {dimension_numbers = #tpu.dot_dimension_numbers<[1], [0], [0], [1], [0, 0, 1, 1], [], []>} : vector<4x16xf32>, vector<16x256xf32>, vector<4x256xf32> -> vector<4x256xf32>
    %cst_44 = arith.constant dense<0.000000e+00> : vector<4x256xf32>
    %68 = tpu.matmul %64, %66, %cst_44 {dimension_numbers = #tpu.dot_dimension_numbers<[1], [0], [0], [1], [0, 0, 1, 1], [], []>} : vector<4x16xf32>, vector<16x256xf32>, vector<4x256xf32> -> vector<4x256xf32>
    %c0_45 = arith.constant 0 : index
    %c0_46 = arith.constant 0 : index
    %c0_47 = arith.constant 0 : index
    %69 = vector.load %arg1[%c0_45, %c0_46, %c0_47] : memref<1x4x256xf32, #tpu.memory_space<vmem>>, vector<1x4x256xf32>
    %70 = vector.shape_cast %69 : vector<1x4x256xf32> to vector<4x256xf32>
    %71 = arith.mulf %70, %68 : vector<4x256xf32>
    %72 = arith.mulf %71, %67 : vector<4x256xf32>
    %c0_48 = arith.constant 0 : index
    %c0_49 = arith.constant 0 : index
    %c0_50 = arith.constant 0 : index
    %73 = vector.load %arg10[%c0_48, %c0_49, %c0_50] : memref<1x4x256xf32, #tpu.memory_space<vmem>>, vector<1x4x256xf32>
    %74 = vector.shape_cast %73 : vector<1x4x256xf32> to vector<4x256xf32>
    %75 = vector.shape_cast %72 : vector<4x256xf32> to vector<1x4x256xf32>
    tpu.vector_store %arg10[%c0_48, %c0_49, %c0_50], %75 {strides = array<i32>} : memref<1x4x256xf32, #tpu.memory_space<vmem>>, vector<1x4x256xf32>,
    return
  }
  func.func @transform_0(%arg0: i32) -> (i32, i32, i32) {
    %c0_i32 = arith.constant 0 : i32
    %c0_i32_0 = arith.constant 0 : i32
    %c0_i32_1 = arith.constant 0 : i32
    return %arg0, %c0_i32, %c0_i32_0 : i32, i32, i32
  }
  func.func @transform_1(%arg0: i32) -> (i32, i32) {
    %c0_i32 = arith.constant 0 : i32
    %c0_i32_0 = arith.constant 0 : i32
    %c0_i32_1 = arith.constant 0 : i32
    return %c0_i32, %c0_i32_0 : i32, i32
  }
  func.func @transform_2(%arg0: i32) -> (i32, i32) {
    %c0_i32 = arith.constant 0 : i32
    %c0_i32_0 = arith.constant 0 : i32
    %c0_i32_1 = arith.constant 0 : i32
    return %c0_i32, %c0_i32_0 : i32, i32
  }
  func.func @transform_3(%arg0: i32) -> (i32, i32) {
    %c0_i32 = arith.constant 0 : i32
    %c0_i32_0 = arith.constant 0 : i32
    %c0_i32_1 = arith.constant 0 : i32
    return %c0_i32, %c0_i32_0 : i32, i32
  }
  func.func @transform_4(%arg0: i32) -> (i32, i32) {
    %c0_i32 = arith.constant 0 : i32
    %c0_i32_0 = arith.constant 0 : i32
    %c0_i32_1 = arith.constant 0 : i32
    return %c0_i32, %c0_i32_0 : i32, i32
  }
  func.func @transform_5(%arg0: i32) -> (i32, i32) {
    %c0_i32 = arith.constant 0 : i32
    %c0_i32_0 = arith.constant 0 : i32
    %c0_i32_1 = arith.constant 0 : i32
    return %c0_i32, %c0_i32_0 : i32, i32
  }
  func.func @transform_6(%arg0: i32) -> (i32, i32) {
    %c0_i32 = arith.constant 0 : i32
    %c0_i32_0 = arith.constant 0 : i32
    %c0_i32_1 = arith.constant 0 : i32
    return %c0_i32, %c0_i32_0 : i32, i32
  }
  func.func @transform_7(%arg0: i32) -> (i32, i32) {
    %c0_i32 = arith.constant 0 : i32
    %c0_i32_0 = arith.constant 0 : i32
    %c0_i32_1 = arith.constant 0 : i32
    return %c0_i32, %c0_i32_0 : i32, i32
  }
  func.func @transform_8(%arg0: i32) -> (i32, i32) {
    %c0_i32 = arith.constant 0 : i32
    %c0_i32_0 = arith.constant 0 : i32
    %c0_i32_1 = arith.constant 0 : i32
    return %c0_i32, %c0_i32_0 : i32, i32
  }
  func.func @transform_9(%arg0: i32) -> (i32, i32, i32) {
    %c0_i32 = arith.constant 0 : i32
    %c0_i32_0 = arith.constant 0 : i32
    %c0_i32_1 = arith.constant 0 : i32
    return %arg0, %c0_i32, %c0_i32_0 : i32, i32, i32
  }
}

</mosaic_0001>

<bundles_post_ra>
// kernel: tpu_custom_call.1
= control target key start
LH: loop header
LB: loop body
LE: loop exit
PB: predicated region body
PF: predicated region fallthrough
CT: control target
= control target key end

     0   :  { %14 = vsyncpa [#allocation3], 0  ;;  %s1670_s0 = inlined_call_operand.vmem [shape: f32[2,4,256], index: 0, kind: input, shape index: {}]   ;;  %s1671_s1 = inlined_call_operand.vmem [shape: f32[8,4], index: 1, kind: input, shape index: {}]   ;;  %s1672_s2 = inlined_call_operand.vmem [shape: f32[8,1], index: 2, kind: input, shape index: {}]   ;;  %s1673_s3 = inlined_call_operand.vmem [shape: f32[4,8], index: 3, kind: input, shape index: {}]   ;;  %s1674_s4 = inlined_call_operand.vmem [shape: f32[4,1], index: 4, kind: input, shape index: {}]   ;;  %s1675_s5 = inlined_call_operand.hbm [shape: f32[4,8], index: 5, kind: input, shape index: {}]   ;;  %s1676_s6 = inlined_call_operand.vmem [shape: f32[4,1], index: 6, kind: input, shape index: {}]   ;;  %s1677_s7 = inlined_call_operand.vmem [shape: f32[16,256], index: 7, kind: input, shape index: {}]   ;;  %s1678_s8 = inlined_call_operand.hbm [shape: f32[16,256], index: 8, kind: input, shape index: {}]   ;;  %s1679_s9 = inlined_call_operand.hbm [shape: f32[2,4,256], index: 9, kind: output, shape index: {}]  }
   0x1   :  { %15 = vsyncpa [#allocation6], 0 }
   0x2   :  { %16 = vsyncpa [#allocation4], 0 }
   0x3   :  { %18 = vsyncpa [#allocation4 + $0x1], 0  ;;  %s1444_s30 = smov 0   ;;  %s1446_s10 = smov 0  }
   0x4   :  { %s1448_s11 = smov 0   ;;  %s1450_s12 = smov 0  }
   0x5 LB: > { %s1465_s13 = sadd.s32 4294967295, %s1384_s12   ;;  %s1110_s14 = sadd.s32 4294967294, %s1384_s12   ;;  %s1384_s12 = sphi %s1450_s12, %s1699_s12   ;;  %s1380_s11 = sphi %s1448_s11, %s1698_s11   ;;  %s1376_s10 = sphi %s1446_s10, %s1697_s10   ;;  %s1372_s30 = sphi %s1444_s30, %s1696_s30  }
   0x6   : > { %s1469_s15 = sadd.s32 1, %s1384_s12   ;;  %s225_s16 = sadd.s32 1, %s1380_s11 }
   0x7   : > { %s222_s17 = ssub.s32 %s1384_s12, %s1469_s15  ;;  %p235_p0 = scmp.ne.s32.totalorder %s1380_s11, %s1376_s10 }
   0x8   : > { %p223_p1 = scmp.eq.s32.totalorder %s222_s17, 0  ;;  %p236_p2 = scmp.eq.s32.totalorder %s1465_s13, 1 }
   0x9   : > { %p241_p3 = scmp.ne.s32.totalorder %s1376_s10, %s1372_s30  ;;  %p242_p4 = scmp.eq.s32.totalorder %s1110_s14, 1 }
   0xa   : > { %s1480_s18 = scalar_select %p223_p1, %s1380_s11, %s225_s16  }
   0xb   : > { %p1482_p5 = por %p236_p2, %p235_p0  ;;  %p1486_p6 = por %p242_p4, %p241_p3 }
   0xc   : > { %1683 = sst [smem:[#allocation11_spill]] %s1480_s18  ;;  %p1111_p7 = scmp.ge.s32.totalorder %s1384_s12, 1 }
   0xd   : > { %s1684_s19 = scalar_select %p1482_p5, 1, 0 }
   0xe   : > { %s1685_s20 = scalar_select %p1486_p6, 1, 0 }
   0xf   : > { %p249_p8 = scmp.lt.s32.totalorder %s1384_s12, 3  ;;  %p1680_p9 = scmp.eq.s32.totalorder %s1465_s13, 0 }
  0x10   : > { %s1386_s22 = smov [#allocation2]   ;;  %s1387_s24 = smov [#allocation5]  }
  0x11   : > { %p1493_p10 = pnand %p1111_p7, %p249_p8  ;;  %s274_s23 = sshll.u32 %s1386_s22, 4  ;;  %s275_s23 = int_to_ptr.vmem [resolvable:$true] %s274_s23 }
  0x12   : > { %s290_s25 = sshll.u32 %s1387_s24, 4  ;;  %s1258_s29 = scalar_lea.hbm %s1675_s5, 64  ;;  %s1505_s25 = int_to_ptr.vmem [resolvable:$true] %s290_s25 }
  0x13   : > { %s1686_s21 = scalar_select %p1493_p10, 1, 0 }
  0x14   : > { %p1192_p11 = pneg %p1493_p10  ;;  %p1259_p13 = scmp.ne.s32.totalorder %s1675_s5, %s1258_s29 }
  0x15   : > { %p1265_p3 = scmp.lt.u32.totalorder %s1258_s29, %s1675_s5 }
  0x16   : > { %p1501_p12 = pnand %p1680_p9, %p1192_p11 }
  0x18   : > { %p1260_p0 = pneg %p1501_p12 }
  0x1a   : > { %p1261_p1 = pnand %p1260_p0, %p1259_p13 }
  0x1c   : > { %p1262_p2 = pneg %p1261_p1 }
  0x1e   : > { %p1267_p4 = pnand %p1265_p3, %p1262_p2 }
  0x20   : > { %1270 = shalt.err (!%p1267_p4)
}
  0x21   : > { %s1271_s24 = scalar_lea.vmem %s275_s23, 64  ;;  %p1279_p9 = scmp.lt.s32.totalorder %s275_s23, %s275_s23 }
  0x22   : > { %p1272_p7 = scmp.ne.s32.totalorder %s275_s23, %s1271_s24  ;;  %p1280_p6 = scmp.lt.s32.totalorder %s1271_s24, %s1271_s24 }
  0x24   : > { %p1274_p8 = pnand %p1272_p7, %p1260_p0  ;;  %p1281_p5 = por %p1280_p6, %p1279_p9 }
  0x26   : > { %p1275_p11 = pneg %p1274_p8 }
  0x28   : > { %p1282_p10 = pnand %p1281_p5, %p1275_p11 }
  0x2a   : > { %1285 = shalt.err (!%p1282_p10)
}
  0x2b   : > { %1195 = dma.hbm_to_vmem [thread:$0]  (!%p1501_p12), %s1675_s5, 64, %s275_s23, [#allocation3]  }
  0x2c   : > { %s1286_s16 = scalar_lea.hbm %s1678_s8, 512 }
  0x2d   : > { %p1287_p13 = scmp.ne.s32.totalorder %s1678_s8, %s1286_s16  ;;  %p1293_p9 = scmp.lt.u32.totalorder %s1286_s16, %s1678_s8 }
  0x2f   : > { %p1289_p6 = pnand %p1287_p13, %p1260_p0 }
  0x31   : > { %p1290_p5 = pneg %p1289_p6 }
  0x33   : > { %p1295_p10 = pnand %p1293_p9, %p1290_p5 }
  0x35   : > { %1298 = shalt.err (!%p1295_p10)
}
  0x36   : > { %s1299_s23 = scalar_lea.vmem %s1505_s25, 512  ;;  %p1307_p4 = scmp.lt.s32.totalorder %s1505_s25, %s1505_s25 }
  0x37   : > { %p1300_p1 = scmp.ne.s32.totalorder %s1505_s25, %s1299_s23  ;;  %p1308_p7 = scmp.lt.s32.totalorder %s1299_s23, %s1299_s23 }
  0x39   : > { %p1302_p2 = pnand %p1300_p1, %p1260_p0  ;;  %p1309_p8 = por %p1308_p7, %p1307_p4 }
  0x3b   : > { %p1303_p3 = pneg %p1302_p2 }
  0x3d   : > { %p1310_p11 = pnand %p1309_p8, %p1303_p3 }
  0x3f   : > { %1313 = shalt.err (!%p1310_p11)
}
  0x40   : > { %s1388_s18 = smov 256   ;;  %s1389_s27 = smov 16  }
  0x41   : > { %1198 = dma.hbm_to_vmem [thread:$0]  (!%p1501_p12), %s1678_s8, 512, %s1505_s25, [#allocation6], %s1388_s18, %s1388_s18, %s1389_s27  }
  0x42   : > { %p1688_p13 = scmp.ne.s32.totalorder %s1686_s21, 0 }
  0x43   : > { %p1689_p0 = scmp.eq.s32.totalorder (!%p1688_p13), %s1465_s13, 0 }
  0x44   : > { %314 = sbr.rel (%p1688_p13) target bundleno = 1005 (0x3ed), region = 56 }
  0x4b   : > { %1359 = dma.done.wait (%p1689_p0), [#allocation3], 64   ;;  %p1690_p6 = pmov %p1689_p0 }
  0x4c   : > { %p1691_p5 = pmov %p1689_p0 }
  0x4d   : > { %1361 = vsyncadd (%p1690_p6), [#allocation3], 4294967232 }
  0x4e   : > { %1363 = dma.done.wait (%p1691_p5), [#allocation6], 512   ;;  %p1692_p9 = pmov %p1689_p0 }
  0x4f   : > { %p354_p10 = scmp.lt.s32.totalorder %s1465_s13, 1  ;;  %v361_v0 = vld [vmem:[%s1677_s7 + $0x8] sm:$0xff]  ;;  %v363_v1 = vld [vmem:[%s1677_s7 + $0x18] sm:$0xff]  ;;  %v360_v5 = vld [vmem:[%s1677_s7] sm:$0xff]  ;;  %v1390_v14 = vmov 0.0   ;;  %vm1391_vm0 = vmmov 0  }
  0x50   : > { %1365 = vsyncadd (%p1692_p9), [#allocation6], 4294966784  ;;  %v365_v2 = vld [vmem:[#allocation5 + $0x8] sm:$0xff]  ;;  %v1575_v3 = vpack.c.bf16 %v363_v1, %v361_v0  ;;  %v367_v4 = vld [vmem:[#allocation5 + $0x18] sm:$0xff]  ;;  %v1392_v16 = vmov 0   ;;  %vm538_vm1 = vcmask 1043456  }
  0x51   : > { %s355_s26 = scalar_select %p354_p10, %s1465_s13, 1  ;;  %v362_v6 = vld [vmem:[%s1677_s7 + $0x10] sm:$0xff]  ;;  %v1583_v7 = vpack.c.bf16 %v367_v4, %v365_v2  ;;  %v364_v9 = vld [vmem:[#allocation5] sm:$0xff]  ;;  %1247 = vset.pattern.permute.xlu0 %v1392_v16  ;;  %1248 = vset.pattern.permute.xlu1 %v1392_v16  ;;  %v528_v17 = vld [vmem:[%s1676_s6] sm:$0xf]  ;;  %vm534_vm2 = vcmask 31744  }
  0x52   : > { %v1585_v8 = vpack.c.bf16 %v362_v6, %v360_v5  ;;  %v366_v10 = vld [vmem:[#allocation5 + $0x10] sm:$0xff]  ;;  %1167 = vmatprep.subr.bf16.mxu0 %v1575_v3  ;;  %v516_v15 = vld [vmem:[%s1672_s2] sm:$0xff]  ;;  %vm695_vm3 = vcmask 64512   ;;  %vm854_vm4 = vcmask 130048   ;;  %s351_s27 = sand.u32 1, %s1376_s10   ;;  %s1137_s29 = sshll.u32 %s1465_s13, 7 }
  0x53   : > { %s1136_s25 = sshll.u32 %s355_s26, 3  ;;  %v1590_v12 = vpack.c.bf16 %v366_v10, %v364_v9  ;;  %1171 = vmatprep.subr.bf16.mxu1 %v1583_v7  ;;  %519 = vperm.xlu0 %1247, %v516_v15   ;;  %v513_v22 = vld [vmem:[%s1671_s1] sm:$0xff]  ;;  %s1118_s28 = sshll.u32 %s351_s27, 3 }
  0x54   : > { %s358_s16 = scalar_lea.vmem %s1670_s0, %s1136_s25  ;;  %1169 = vmatpush1.bf16.xpose.msra.mxu0 %v1585_v8  ;;  %v522_v25 = vld [vmem:[%s1674_s4] sm:$0xf]  ;;  %s353_s26 = scalar_lea.vmem [#allocation7], %s1118_s28 }
  0x55   : > { %v1587_v11 = vld [vmem:[%s358_s16] sm:$0xff]  ;;  %1173 = vmatpush1.bf16.xpose.msra.mxu1 %v1590_v12  ;;  %1146 = vmatprep.subr.mxu0 %v1390_v14  ;;  %s1029_s25 = sshll.u32 %s353_s26, 4  ;;  %s1628_s16 = scalar_lea.hbm %s1679_s9, %s1137_s29  ;;  %s1630_s25 = int_to_ptr.vmem [resolvable:$true] %s1029_s25 }
  0x56   : > { %v369_v13 = vcombine.high %v1587_v11, %v1587_v11  ;;  %1151 = vmatprep.subr.mxu1 %v1390_v14  ;;  %525 = vperm.xlu1 %1248, %v522_v25   ;;  %v514_v42 = vld [vmem:[%s1673_s3] sm:$0xf]  ;;  %s1015_s17 = scalar_lea.sflag [#allocation4], %s351_s27  ;;  %s1314_s22 = scalar_lea.vmem %s1630_s25, 128 }
  0x57   : > { %531 = vperm.xlu0 %1247, %v528_v17   ;;  %v515_v44 = vld [vmem:[#allocation2] sm:$0xf]  ;;  %p1315_p12 = scmp.ne.s32.totalorder %s1630_s25, %s1314_s22  ;;  %p1693_p1 = scmp.ne.s32.totalorder %s1684_s19, 0 }
  0x58   : > { %435 = vmatprep.mubr.f32.mxu0 %v369_v13  ;;  %505 = vmatprep.mubr.f32.mxu1 %v369_v13  ;;  %s1393_s13 = smov [#allocation7]  }
  0x59   : > { %p1316_p2 = pnand %p1315_p12, %p1693_p1  ;;  %s1318_s24 = sshll.u32 %s1393_s13, 4  ;;  %s1319_s24 = int_to_ptr.vmem [resolvable:$false] %s1318_s24 }
  0x5a   : > { %s1320_s23 = scalar_lea.vmem %s1319_s24, 256  ;;  %p1321_p4 = scmp.lt.s32.totalorder %s1630_s25, %s1319_s24 }
  0x5b   : > { %436 = vmatmul.mubr.f32.vlgmr.msra.gmra.mrb[0].mxu0 %v1587_v11  ;;  %p1317_p3 = pneg %p1316_p2  ;;  %p1322_p7 = scmp.lt.s32.totalorder %s1320_s23, %s1314_s22 }
  0x5c   : > { %506 = vmatmul.mubr.f32.vlgmr.msra.gmra.mrb[0].mxu1 %v1587_v11  ;;  %1148 = vmatprep.mubr.msk.f32.mxu0 %vm1391_vm0, %v1390_v14 }
  0x5d   : > { %1153 = vmatprep.mubr.msk.f32.mxu1 %vm1391_vm0, %v1390_v14  ;;  %p1323_p8 = por %p1322_p7, %p1321_p4 }
  0x5f   : > { %p1324_p11 = pnand %p1323_p8, %p1317_p3 }
  0xd2   : > { %v520_v26 = vpop.permute.xlu0 %519 }
  0xd5   : > { %v526_v45 = vpop.permute.xlu1 %525 }
  0xd6   : > { %v532_v46 = vpop.permute.xlu0 %531 }
 0x12e   : > { %v437_v18 = vpop.f32.mrb[0].mxu0 }
 0x12f   : > { %v511_v19 = vmul.f32 0.0625, %v437_v18  ;;  %v507_v20 = vpop.f32.mrb[0].mxu1  ;;  %v439_v21 = vpop.f32.mrb[1].mxu0 }
 0x130   : > { %v512_v23 = vmul.f32 0.0625, %v507_v20  ;;  %v509_v24 = vpop.f32.mrb[1].mxu1 }
 0x131   : > { %1147 = vmatpush3.msk.msra.mxu0 %vm538_vm1, %v511_v19 }
 0x132   : > { %1152 = vmatpush3.msk.msra.mxu1 %vm538_vm1, %v512_v23  ;;  %1149 = vmatmul.mubr.msk.f32.vlgmr.msra.gmra.mrb[2].mxu0 %vm534_vm2, %v513_v22 }
 0x133   : > { %1154 = vmatmul.mubr.msk.f32.vlgmr.msra.gmra.mrb[2].mxu1 %vm534_vm2, %v513_v22  ;;  %1156 = vmatprep.subr.mxu0 %v1390_v14 }
 0x134   : > { %1161 = vmatprep.subr.mxu1 %v1390_v14  ;;  %1163 = vmatprep.mubr.msk.f32.mxu1 %vm1391_vm0, %v1390_v14 }
 0x135   : > { %1158 = vmatprep.mubr.msk.f32.mxu0 %vm1391_vm0, %v1390_v14 }
 0x205   : > { %v608_v27 = vpop.f32.mrb[2].mxu0 }
 0x206   : > { %v609_v28 = vadd.f32 %v608_v27, %v520_v26  ;;  %v681_v29 = vpop.f32.mrb[2].mxu1  ;;  %v1150_v30 = vpop.f32.mrb[3].mxu0 }
 0x207   : > { %v682_v31 = vadd.f32 %v681_v29, %v520_v26  ;;  %v1155_v32 = vpop.f32.mrb[3].mxu1 }
 0x208   : > { %v685_v33 = vadd.f32 3.0, %v609_v28 }
 0x209   : > { %v690_v34 = vadd.f32 3.0, %v682_v31 }
 0x20a   : > { %v686_v35 = vmax.f32 %v685_v33, 0.0 }
 0x20b   : > { %v691_v36 = vmax.f32 %v690_v34, 0.0 }
 0x20c   : > { %v687_v37 = vmin.f32 %v686_v35, 6.0 }
 0x20d   : > { %v692_v38 = vmin.f32 %v691_v36, 6.0 }
 0x20e   : > { %v688_v39 = vmul.f32 %v687_v37, %v609_v28 }
 0x20f   : > { %v693_v40 = vmul.f32 %v692_v38, %v682_v31 }
 0x210   : > { %v689_v41 = vmul.f32 0.16666667, %v688_v39 }
 0x211   : > { %v694_v43 = vmul.f32 0.16666667, %v693_v40 }
 0x212   : > { %1157 = vmatpush3.msra.mxu0 %v689_v41 }
 0x213   : > { %1162 = vmatpush3.msra.mxu1 %v694_v43  ;;  %1159 = vmatmul.mubr.msk.f32.vlgmr.msra.gmra.mrb[4].mxu0 %vm695_vm3, %v514_v42 }
 0x214   : > { %1164 = vmatmul.mubr.msk.f32.vlgmr.msra.gmra.mrb[4].mxu1 %vm695_vm3, %v515_v44  ;;  %1179 = vmatprep.subr.bf16.mxu1 %v1583_v7 }
 0x215   : > { %1181 = vmatpush1.bf16.msra.mxu1 %v1590_v12  ;;  %1175 = vmatprep.subr.bf16.mxu0 %v1575_v3 }
 0x216   : > { %1177 = vmatpush1.bf16.msra.mxu0 %v1585_v8  ;;  %996 = vmatprep.mubr.f32.mxu1 %v1390_v14 }
 0x217   : > { %922 = vmatprep.mubr.f32.mxu0 %v1390_v14 }
 0x2e6   : > { %v765_v47 = vpop.f32.mrb[4].mxu0 }
 0x2e7   : > { %v844_v48 = vpop.f32.mrb[4].mxu1  ;;  %v766_v49 = vadd.f32 %v765_v47, %v526_v45  ;;  %v1160_v50 = vpop.f32.mrb[5].mxu0 }
 0x2e8   : > { %v845_v51 = vadd.f32 %v844_v48, %v532_v46  ;;  %v1165_v52 = vpop.f32.mrb[5].mxu1 }
 0x2e9   : > { %v1126_v53 = vmul.f32 -1.442695, %v766_v49 }
 0x2ea   : > { %v1128_v54 = vmul.f32 -1.442695, %v845_v51 }
 0x2eb   : > { %1250 = vpow2.f32 %v1126_v53 }
 0x2ec   : > { %1252 = vpow2.f32 %v1128_v54 }
 0x2f5   : > { %v1251_v55 = vpop.eup %1250 }
 0x2f6   : > { %v1253_v56 = vpop.eup %1252  ;;  %v772_v57 = vadd.f32 1.0, %v1251_v55 }
 0x2f7   : > { %v851_v58 = vadd.f32 1.0, %v1253_v56 }
 0x2f8   : > { %1254 = vrcp.f32 %v772_v57 }
 0x2f9   : > { %1256 = vrcp.f32 %v851_v58 }
 0x302   : > { %v1255_v59 = vpop.eup %1254 }
 0x303   : > { %v1257_v60 = vpop.eup %1256  ;;  %1129 = vmatmul.mubr.msk.f32.vlgmr.msra.gmra.mrb[6].mxu0 %vm854_vm4, %v1255_v59 }
 0x304   : > { %1130 = vmatmul.mubr.msk.f32.vlgmr.msra.gmra.mrb[6].mxu1 %vm854_vm4, %v1257_v60 }
 0x3d6   : > { %v924_v61 = vpop.f32.mrb[6].mxu0 }
 0x3d7   : > { %v998_v62 = vpop.f32.mrb[6].mxu1  ;;  %v926_v63 = vpop.f32.mrb[7].mxu0 }
 0x3d8   : > { %v1000_v0 = vpop.f32.mrb[7].mxu1  ;;  %v1010_v1 = vcombine.low %v924_v61, %v926_v63 }
 0x3d9   : > { %v1005_v2 = vcombine.low %v998_v62, %v1000_v0 }
 0x3db   : > { %v1007_v3 = vmul.f32 %v1005_v2, %v1587_v11 }
 0x3dd   : > { %v1012_v4 = vmul.f32 %v1010_v1, %v1007_v3 }
 0x3df   : > { %1013 = vst [vmem:[%s353_s26] sm:$0xff] %v1012_v4 }
 0x3e0   : > { %1327 = shalt.err (!%p1324_p11)
}
 0x3e1   : > { %s1328_s18 = scalar_lea.hbm %s1628_s16, 128  ;;  %s1332_s29 = scalar_lea.hbm %s1679_s9, 256 }
 0x3e2   : > { %p1329_p13 = scmp.ne.s32.totalorder %s1628_s16, %s1328_s18  ;;  %p1333_p5 = scmp.lt.u32.totalorder %s1628_s16, %s1679_s9 }
 0x3e3   : > { %p1334_p9 = scmp.lt.u32.totalorder %s1332_s29, %s1328_s18  ;;  %p1336_p12 = scmp.lt.u32.totalorder %s1328_s18, %s1628_s16 }
 0x3e4   : > { %p1330_p0 = pnand %p1329_p13, %p1693_p1 }
 0x3e5   : > { %p1335_p10 = por %p1334_p9, %p1333_p5 }
 0x3e6   : > { %p1331_p6 = pneg %p1330_p0 }
 0x3e7   : > { %p1337_p2 = por %p1336_p12, %p1335_p10 }
 0x3e9   : > { %p1338_p3 = pnand %p1337_p2, %p1331_p6 }
 0x3eb   : > { %1341 = shalt.err (!%p1338_p3)
}
 0x3ec   : > { %1190 = dma.vmem_to_hbm [thread:$0]  (%p1693_p1), %s1630_s25, 128, %s1628_s16, %s1015_s17  }
 0x3ed PF: > { %p1207_p4 = scmp.ge.s32.totalorder %s1384_s12, 2  ;;  %s1041_s21 = sand.u32 1, %s1372_s30  }
 0x3ee   : > { %p1694_p7 = scmp.ne.s32.totalorder %s1685_s20, 0  ;;  %s1042_s22 = scalar_lea.sflag [#allocation4], %s1041_s21 }
 0x3f0   : > { %p1200_p8 = pnand %p1207_p4, %p1694_p7 }
 0x3f2   : > { %1367 = dma.done.wait (!%p1200_p8), %s1042_s22, 128  }
 0x3f3   : > { %1369 = vsyncadd (!%p1200_p8), %s1042_s22, 4294967168  ;;  %s1695_s13 = sld [smem:[#allocation11_spill]]  ;;  %p21_p11 = scmp.ge.s32.totalorder %s1469_s15, 4  }
 0x3f4   : > { %s1696_s30 = smov %s1376_s10  ;;  %s1697_s10 = smov %s1380_s11 }
 0x3f5   : > { %s1699_s12 = smov %s1469_s15  ;;  %23 = sbr.rel (!%p21_p11) target bundleno = 5 (0x5), region = 100 }
 0x3f9   : > { %s1698_s11 = smov %s1695_s13 }
 0x3fc   :  { %1047 = vsyncpa [#allocation3], 1 }
 0x3fd   :  { %1049 = vsyncpa [#allocation3 + $0x1], 1 }
 0x3fe   :  { %1050 = vsyncpa [#allocation6], 1 }
 0x3ff   :  { %1051 = vsyncpa [#allocation4], 1 }
 0x400   :  { %1053 = vsyncpa [#allocation4 + $0x1], 1 }

</bundles_post_ra>
